<compile_context>
chip_gen: v5e
topology: v5e:2x2
jax: 0.10.0
libtpu: 0.0.40
codegen_flags: <defaults>
</compile_context>

<pallas_src>
import jax
import jax.numpy as jnp
from jax.experimental import pallas as pl
from jax.experimental.pallas import tpu as pltpu


TILE_B = 8  # sequences per grid program (sublane-friendly multiple of 8)


def neuralnet_kernel(idx_ref, table_ref, w1_ref, b1_ref, wc_ref, bc_ref, out_ref):
    # idx_ref:   (TILE_B, seq)   int32  word indices (lane-major)
    # table_ref: (vocab, emb)    f32    embedding table
    # w1_ref:    (emb, hidden)   f32    linear1 weight (pre-transposed)
    # b1_ref:    (1, hidden)     f32
    # wc_ref:    (hidden, 2)     f32    clf weight (pre-transposed)
    # bc_ref:    (1, 2)          f32
    # out_ref:   (TILE_B, 2)     f32    logits per sequence
    tile_b, seq = idx_ref.shape
    vocab, _ = table_ref.shape

    idx = idx_ref[...]                                                # (tile_b, seq)
    vocab_iota = jax.lax.broadcasted_iota(jnp.int32, (tile_b, vocab), 1)

    # Embedding-bag via counts vector: counts[b, v] = #occurrences of word v in
    # sequence b.  Static, fully-unrolled loop over seq; VPU compare + add only.
    counts = jnp.zeros((tile_b, vocab), jnp.float32)
    for s in range(seq):                                              # seq is small/static
        counts = counts + (vocab_iota == idx[:, s:s + 1]).astype(jnp.float32)
    # TODO(synk): for large seq, switch to scalar-prefetch gather (indices in SMEM).

    # Mean folded into one VPU scale; single (tile_b, vocab) @ (vocab, emb) matmul.
    meaned = jnp.dot(counts * (1.0 / seq), table_ref[...],
                     preferred_element_type=jnp.float32)              # (tile_b, emb)

    # Hidden layer + ReLU.
    h = jnp.dot(meaned, w1_ref[...],
                preferred_element_type=jnp.float32) + b1_ref[...]     # (tile_b, hidden)
    h = jnp.maximum(h, 0.0)

    # Classifier head (raw logits, matching the PyTorch forward).
    out_ref[...] = jnp.dot(h, wc_ref[...],
                           preferred_element_type=jnp.float32) + bc_ref[...]


def neuralnet_forward_batched(in_indices, table, w1, b1, wc, bc):
    """in_indices: (B, seq) int32 — B independent sequences.  Returns (B, 2) f32."""
    B, seq = in_indices.shape
    vocab, emb_dim = table.shape
    hidden = w1.shape[1]

    # Pad batch to a multiple of TILE_B (pad rows use index 0; outputs dropped).
    B_pad = ((B + TILE_B - 1) // TILE_B) * TILE_B
    idx = jnp.zeros((B_pad, seq), jnp.int32).at[:B].set(in_indices.astype(jnp.int32))

    b1_2d = b1.reshape(1, hidden).astype(jnp.float32)
    bc_2d = bc.reshape(1, 2).astype(jnp.float32)

    out = pl.pallas_call(
        neuralnet_kernel,
        out_shape=jax.ShapeDtypeStruct((B_pad, 2), jnp.float32),
        grid=(B_pad // TILE_B,),
        in_specs=[
            pl.BlockSpec((TILE_B, seq), lambda i: (i, 0)),      # per-tile indices
            pl.BlockSpec((vocab, emb_dim), lambda i: (0, 0)),   # resident across grid
            pl.BlockSpec((emb_dim, hidden), lambda i: (0, 0)),
            pl.BlockSpec((1, hidden), lambda i: (0, 0)),
            pl.BlockSpec((hidden, 2), lambda i: (0, 0)),
            pl.BlockSpec((1, 2), lambda i: (0, 0)),
        ],
        out_specs=pl.BlockSpec((TILE_B, 2), lambda i: (i, 0)),
        compiler_params=pltpu.CompilerParams(
            dimension_semantics=("parallel",)),  # v7x: both TCs split the batch
    )(idx, table.astype(jnp.float32), w1.astype(jnp.float32), b1_2d,
      wc.astype(jnp.float32), bc_2d)
    return out[:B]


def neuralnet_forward(in_indices, table, w1, b1, wc, bc):
    """Single-sequence API matching NeuralNet.forward: (seq,) int32 -> (2,) f32."""
    return neuralnet_forward_batched(in_indices.reshape(1, -1),
                                     table, w1, b1, wc, bc)[0]


def reference_forward(in_indices, table, w1, b1, wc, bc):
    """Pure-JAX reference mirroring the PyTorch forward (one sequence)."""
    embed = table[in_indices]                 # (seq, emb)
    meaned = embed.mean(axis=0)               # (emb,)
    h = jnp.maximum(meaned @ w1 + b1, 0.0)    # (hidden,)
    return h @ wc + bc                        # (2,)


if __name__ == "__main__":
    vocab, emb_dim, hidden, seq, batch = 16, 32, 32, 8, 16

    key = jax.random.PRNGKey(0)
    k_tab, k_idx, k_w1, k_b1, k_wc, k_bc = jax.random.split(key, 6)

    # Deterministic synthetic parameters (shapes follow the module).
    table = jax.random.normal(k_tab, (vocab, emb_dim), dtype=jnp.float32)
    w1 = jax.random.normal(k_w1, (emb_dim, hidden), dtype=jnp.float32) * 0.1
    b1 = jax.random.normal(k_b1, (hidden,), dtype=jnp.float32) * 0.1
    wc = jax.random.normal(k_wc, (hidden, 2), dtype=jnp.float32) * 0.1
    bc = jax.random.normal(k_bc, (2,), dtype=jnp.float32) * 0.1
    # TODO(synk): self.linear2 is defined in __init__ but never used in forward; omitted.

    in_indices = jax.random.randint(k_idx, (batch, seq), 0, vocab, dtype=jnp.int32)

    # Batched path (many sequences per launch).
    out = neuralnet_forward_batched(in_indices, table, w1, b1, wc, bc)
    jax.block_until_ready(out)
    ref = jax.vmap(lambda ix: reference_forward(ix, table, w1, b1, wc, bc))(in_indices)
    assert out.shape == (batch, 2)
    assert jnp.allclose(out, ref, atol=1e-5, rtol=1e-5), (out, ref)

    # Single-sequence path (exact NeuralNet.forward signature).
    out1 = neuralnet_forward(in_indices[0], table, w1, b1, wc, bc)
    jax.block_until_ready(out1)
    assert out1.shape == (2,)
    assert jnp.allclose(out1, ref[0], atol=1e-5, rtol=1e-5), (out1, ref[0])

    print("KERNEL_OK")
</pallas_src>

<mosaic_0001>
module attributes {stable_mosaic.version = 11 : i64} {
  func.func @neuralnet_kernel(%arg0: i32, %arg1: memref<8x8xi32, #tpu.memory_space<vmem>>, %arg2: memref<16x32xf32, #tpu.memory_space<vmem>>, %arg3: memref<32x32xf32, #tpu.memory_space<vmem>>, %arg4: memref<1x32xf32, #tpu.memory_space<vmem>>, %arg5: memref<32x2xf32, #tpu.memory_space<vmem>>, %arg6: memref<1x2xf32, #tpu.memory_space<vmem>>, %arg7: memref<8x2xf32, #tpu.memory_space<vmem>>) attributes {dimension_semantics = [#tpu.dimension_semantics<parallel>], iteration_bounds = array<i64: 2>, scalar_prefetch = 0 : i64, scratch_operands = 0 : i64, tpu.core_type = #tpu.core_type<tc>, window_params = [{transform_indices = @transform_0, window_bounds = array<i64: 8, 8>}, {pipeline_mode = #tpu.pipeline_mode<synchronous>, transform_indices = @transform_1, window_bounds = array<i64: 16, 32>}, {pipeline_mode = #tpu.pipeline_mode<synchronous>, transform_indices = @transform_2, window_bounds = array<i64: 32, 32>}, {pipeline_mode = #tpu.pipeline_mode<synchronous>, transform_indices = @transform_3, window_bounds = array<i64: 1, 32>}, {pipeline_mode = #tpu.pipeline_mode<synchronous>, transform_indices = @transform_4, window_bounds = array<i64: 32, 2>}, {pipeline_mode = #tpu.pipeline_mode<synchronous>, transform_indices = @transform_5, window_bounds = array<i64: 1, 2>}, {transform_indices = @transform_6, window_bounds = array<i64: 8, 2>}]} {
    %c0 = arith.constant 0 : index
    %c0_0 = arith.constant 0 : index
    %0 = vector.load %arg1[%c0, %c0_0] : memref<8x8xi32, #tpu.memory_space<vmem>>, vector<8x8xi32>
    %1 = tpu.iota {dimensions = array<i32: 1>} : vector<8x16xi32>
    %cst = arith.constant 0.000000e+00 : f32
    %2 = vector.broadcast %cst : f32 to vector<8x16xf32>
    %3 = vector.extract_strided_slice %0 {offsets = [0, 0], sizes = [8, 1], strides = [1, 1]} : vector<8x8xi32> to vector<8x1xi32>
    %4 = vector.broadcast %3 : vector<8x1xi32> to vector<8x16xi32>
    %5 = arith.cmpi eq, %1, %4 : vector<8x16xi32>
    %6 = arith.extui %5 : vector<8x16xi1> to vector<8x16xi32>
    %7 = arith.sitofp %6 : vector<8x16xi32> to vector<8x16xf32>
    %8 = arith.addf %2, %7 : vector<8x16xf32>
    %9 = vector.extract_strided_slice %0 {offsets = [0, 1], sizes = [8, 1], strides = [1, 1]} : vector<8x8xi32> to vector<8x1xi32>
    %10 = vector.broadcast %9 : vector<8x1xi32> to vector<8x16xi32>
    %11 = arith.cmpi eq, %1, %10 : vector<8x16xi32>
    %12 = arith.extui %11 : vector<8x16xi1> to vector<8x16xi32>
    %13 = arith.sitofp %12 : vector<8x16xi32> to vector<8x16xf32>
    %14 = arith.addf %8, %13 : vector<8x16xf32>
    %15 = vector.extract_strided_slice %0 {offsets = [0, 2], sizes = [8, 1], strides = [1, 1]} : vector<8x8xi32> to vector<8x1xi32>
    %16 = vector.broadcast %15 : vector<8x1xi32> to vector<8x16xi32>
    %17 = arith.cmpi eq, %1, %16 : vector<8x16xi32>
    %18 = arith.extui %17 : vector<8x16xi1> to vector<8x16xi32>
    %19 = arith.sitofp %18 : vector<8x16xi32> to vector<8x16xf32>
    %20 = arith.addf %14, %19 : vector<8x16xf32>
    %21 = vector.extract_strided_slice %0 {offsets = [0, 3], sizes = [8, 1], strides = [1, 1]} : vector<8x8xi32> to vector<8x1xi32>
    %22 = vector.broadcast %21 : vector<8x1xi32> to vector<8x16xi32>
    %23 = arith.cmpi eq, %1, %22 : vector<8x16xi32>
    %24 = arith.extui %23 : vector<8x16xi1> to vector<8x16xi32>
    %25 = arith.sitofp %24 : vector<8x16xi32> to vector<8x16xf32>
    %26 = arith.addf %20, %25 : vector<8x16xf32>
    %27 = vector.extract_strided_slice %0 {offsets = [0, 4], sizes = [8, 1], strides = [1, 1]} : vector<8x8xi32> to vector<8x1xi32>
    %28 = vector.broadcast %27 : vector<8x1xi32> to vector<8x16xi32>
    %29 = arith.cmpi eq, %1, %28 : vector<8x16xi32>
    %30 = arith.extui %29 : vector<8x16xi1> to vector<8x16xi32>
    %31 = arith.sitofp %30 : vector<8x16xi32> to vector<8x16xf32>
    %32 = arith.addf %26, %31 : vector<8x16xf32>
    %33 = vector.extract_strided_slice %0 {offsets = [0, 5], sizes = [8, 1], strides = [1, 1]} : vector<8x8xi32> to vector<8x1xi32>
    %34 = vector.broadcast %33 : vector<8x1xi32> to vector<8x16xi32>
    %35 = arith.cmpi eq, %1, %34 : vector<8x16xi32>
    %36 = arith.extui %35 : vector<8x16xi1> to vector<8x16xi32>
    %37 = arith.sitofp %36 : vector<8x16xi32> to vector<8x16xf32>
    %38 = arith.addf %32, %37 : vector<8x16xf32>
    %39 = vector.extract_strided_slice %0 {offsets = [0, 6], sizes = [8, 1], strides = [1, 1]} : vector<8x8xi32> to vector<8x1xi32>
    %40 = vector.broadcast %39 : vector<8x1xi32> to vector<8x16xi32>
    %41 = arith.cmpi eq, %1, %40 : vector<8x16xi32>
    %42 = arith.extui %41 : vector<8x16xi1> to vector<8x16xi32>
    %43 = arith.sitofp %42 : vector<8x16xi32> to vector<8x16xf32>
    %44 = arith.addf %38, %43 : vector<8x16xf32>
    %45 = vector.extract_strided_slice %0 {offsets = [0, 7], sizes = [8, 1], strides = [1, 1]} : vector<8x8xi32> to vector<8x1xi32>
    %46 = vector.broadcast %45 : vector<8x1xi32> to vector<8x16xi32>
    %47 = arith.cmpi eq, %1, %46 : vector<8x16xi32>
    %48 = arith.extui %47 : vector<8x16xi1> to vector<8x16xi32>
    %49 = arith.sitofp %48 : vector<8x16xi32> to vector<8x16xf32>
    %50 = arith.addf %44, %49 : vector<8x16xf32>
    %cst_1 = arith.constant 1.250000e-01 : f32
    %51 = vector.broadcast %cst_1 : f32 to vector<8x16xf32>
    %52 = arith.mulf %50, %51 : vector<8x16xf32>
    %c0_2 = arith.constant 0 : index
    %c0_3 = arith.constant 0 : index
    %53 = vector.load %arg2[%c0_2, %c0_3] : memref<16x32xf32, #tpu.memory_space<vmem>>, vector<16x32xf32>
    %cst_4 = arith.constant dense<0.000000e+00> : vector<8x32xf32>
    %54 = tpu.matmul %52, %53, %cst_4 {dimension_numbers = #tpu.dot_dimension_numbers<[1], [0], [0], [1], [0, 0, 1, 1], [], []>} : vector<8x16xf32>, vector<16x32xf32>, vector<8x32xf32> -> vector<8x32xf32>
    %c0_5 = arith.constant 0 : index
    %c0_6 = arith.constant 0 : index
    %55 = vector.load %arg3[%c0_5, %c0_6] : memref<32x32xf32, #tpu.memory_space<vmem>>, vector<32x32xf32>
    %cst_7 = arith.constant dense<0.000000e+00> : vector<8x32xf32>
    %56 = tpu.matmul %54, %55, %cst_7 {dimension_numbers = #tpu.dot_dimension_numbers<[1], [0], [0], [1], [0, 0, 1, 1], [], []>} : vector<8x32xf32>, vector<32x32xf32>, vector<8x32xf32> -> vector<8x32xf32>
    %c0_8 = arith.constant 0 : index
    %c0_9 = arith.constant 0 : index
    %57 = vector.load %arg4[%c0_8, %c0_9] : memref<1x32xf32, #tpu.memory_space<vmem>>, vector<1x32xf32>
    %58 = vector.broadcast %57 : vector<1x32xf32> to vector<8x32xf32>
    %59 = arith.addf %56, %58 : vector<8x32xf32>
    %cst_10 = arith.constant 0.000000e+00 : f32
    %60 = vector.broadcast %cst_10 : f32 to vector<8x32xf32>
    %61 = arith.maximumf %59, %60 : vector<8x32xf32>
    %c0_11 = arith.constant 0 : index
    %c0_12 = arith.constant 0 : index
    %62 = vector.load %arg5[%c0_11, %c0_12] : memref<32x2xf32, #tpu.memory_space<vmem>>, vector<32x2xf32>
    %cst_13 = arith.constant dense<0.000000e+00> : vector<8x2xf32>
    %63 = tpu.matmul %61, %62, %cst_13 {dimension_numbers = #tpu.dot_dimension_numbers<[1], [0], [0], [1], [0, 0, 1, 1], [], []>} : vector<8x32xf32>, vector<32x2xf32>, vector<8x2xf32> -> vector<8x2xf32>
    %c0_14 = arith.constant 0 : index
    %c0_15 = arith.constant 0 : index
    %64 = vector.load %arg6[%c0_14, %c0_15] : memref<1x2xf32, #tpu.memory_space<vmem>>, vector<1x2xf32>
    %65 = vector.broadcast %64 : vector<1x2xf32> to vector<8x2xf32>
    %66 = arith.addf %63, %65 : vector<8x2xf32>
    %c0_16 = arith.constant 0 : index
    %c0_17 = arith.constant 0 : index
    %67 = vector.load %arg7[%c0_16, %c0_17] : memref<8x2xf32, #tpu.memory_space<vmem>>, vector<8x2xf32>
    tpu.vector_store %arg7[%c0_16, %c0_17], %66 {strides = array<i32>} : memref<8x2xf32, #tpu.memory_space<vmem>>, vector<8x2xf32>,
    return
  }
  func.func @transform_0(%arg0: i32) -> (i32, i32) {
    %c0_i32 = arith.constant 0 : i32
    %c0_i32_0 = arith.constant 0 : i32
    return %arg0, %c0_i32 : i32, i32
  }
  func.func @transform_1(%arg0: i32) -> (i32, i32) {
    %c0_i32 = arith.constant 0 : i32
    %c0_i32_0 = arith.constant 0 : i32
    %c0_i32_1 = arith.constant 0 : i32
    return %c0_i32, %c0_i32_0 : i32, i32
  }
  func.func @transform_2(%arg0: i32) -> (i32, i32) {
    %c0_i32 = arith.constant 0 : i32
    %c0_i32_0 = arith.constant 0 : i32
    %c0_i32_1 = arith.constant 0 : i32
    return %c0_i32, %c0_i32_0 : i32, i32
  }
  func.func @transform_3(%arg0: i32) -> (i32, i32) {
    %c0_i32 = arith.constant 0 : i32
    %c0_i32_0 = arith.constant 0 : i32
    %c0_i32_1 = arith.constant 0 : i32
    return %c0_i32, %c0_i32_0 : i32, i32
  }
  func.func @transform_4(%arg0: i32) -> (i32, i32) {
    %c0_i32 = arith.constant 0 : i32
    %c0_i32_0 = arith.constant 0 : i32
    %c0_i32_1 = arith.constant 0 : i32
    return %c0_i32, %c0_i32_0 : i32, i32
  }
  func.func @transform_5(%arg0: i32) -> (i32, i32) {
    %c0_i32 = arith.constant 0 : i32
    %c0_i32_0 = arith.constant 0 : i32
    %c0_i32_1 = arith.constant 0 : i32
    return %c0_i32, %c0_i32_0 : i32, i32
  }
  func.func @transform_6(%arg0: i32) -> (i32, i32) {
    %c0_i32 = arith.constant 0 : i32
    %c0_i32_0 = arith.constant 0 : i32
    return %arg0, %c0_i32 : i32, i32
  }
}

</mosaic_0001>

<bundles_post_ra>
// kernel: tpu_custom_call.1
= control target key start
LH: loop header
LB: loop body
LE: loop exit
PB: predicated region body
PF: predicated region fallthrough
CT: control target
= control target key end

     0   :  { %s552_s21 = smov 0   ;;  %s612_s0 = inlined_call_operand.vmem [shape: s32[16,8], index: 0, kind: input, shape index: {}]   ;;  %s613_s1 = inlined_call_operand.vmem [shape: f32[16,32], index: 1, kind: input, shape index: {}]   ;;  %s614_s2 = inlined_call_operand.vmem [shape: f32[32,32], index: 2, kind: input, shape index: {}]   ;;  %s615_s3 = inlined_call_operand.vmem [shape: f32[1,32], index: 3, kind: input, shape index: {}]   ;;  %s616_s4 = inlined_call_operand.vmem [shape: f32[32,2], index: 4, kind: input, shape index: {}]   ;;  %s617_s5 = inlined_call_operand.vmem [shape: f32[1,2], index: 5, kind: input, shape index: {}]   ;;  %s618_s6 = inlined_call_operand.vmem [shape: f32[16,2], index: 6, kind: output, shape index: {}]  }
   0x1 LB: > { %s452_s22 = sadd.s32 4294967295, %s506_s21   ;;  %p456_p0 = scmp.ge.s32.totalorder %s506_s21, 1  ;;  %s506_s21 = sphi %s552_s21, %s16_s21  }
   0x2   : > { %p211_p1 = scmp.lt.s32.totalorder %s506_s21, 3 }
   0x4   : > { %p212_p2 = pnand %p456_p0, %p211_p1 }
   0x5   : > { %p239_p3 = scmp.lt.s32.totalorder (!%p212_p2), %s452_s22, 1 }
   0x6   : > { %215 = sbr.rel (%p212_p2) target bundleno = 548 (0x224), region = 44 }
   0xb   : > { %v508_v0 = vmov 0   ;;  %v509_v1 = vmov 2   ;;  %s620_s22 = smov (!%p239_p3, %s452_s22), 1  ;;  %v510_v2 = vmov 4   ;;  %v511_v4 = vmov 1   ;;  %v308_v9 = vld [vmem:[%s613_s1 + $0x8] sm:$0xff] }
   0xc   : > { %489 = vset.pattern.permute.xlu0 %v508_v0  ;;  %491 = vset.pattern.permute.xlu1 %v509_v1  ;;  %s457_s23 = sshll.u32 %s620_s22, 3  ;;  %v512_v5 = vmov 3   ;;  %v513_v6 = vmov 5   ;;  %v514_v7 = vmov 6   ;;  %v515_v8 = vmov 7   ;;  %v307_v10 = vld [vmem:[%s613_s1] sm:$0xff] }
   0xd   : > { %493 = vset.pattern.permute.xlu2 %v510_v2  ;;  %s242_s26 = scalar_lea.vmem %s612_s0, %s457_s23  ;;  %327 = vmatpush.msra.mxu0 %v308_v9  ;;  %v336_v12 = vld [vmem:[%s614_s2 + $0x18] sm:$0xff]  ;;  %v335_v13 = vld [vmem:[%s614_s2 + $0x10] sm:$0xff]  ;;  %v334_v14 = vld [vmem:[%s614_s2 + $0x8] sm:$0xff]  ;;  %v248_v15 = vlaneseq  ;;  %v516_v22 = vmov 0.0   ;;  %vm309_vm8 = vcmask 130048   ;;  %vm341_vm9 = vcmask 261120   ;;  %s246_s8 = scalar_lea.vmem %s618_s6, %s457_s23 }
   0xe   : > { %v247_v3 = vld [vmem:[%s242_s26] sm:$0xff]  ;;  %357 = vmatpush.msra.mxu1 %v336_v12  ;;  %v369_v42 = vld [vmem:[%s616_s4 + $0x18] sm:$0xff]  ;;  %v368_v44 = vld [vmem:[%s616_s4 + $0x10] sm:$0xff]  ;;  %vm397_vm10 = vcmask 15360  }
   0xf   : > { %251 = vperm.xlu0 %489, %v247_v3   ;;  %265 = vperm.xlu1 %491, %v247_v3   ;;  %v249_v18 = vand.u32 127, %v248_v15  ;;  %v333_v41 = vld [vmem:[%s614_s2] sm:$0xff]  ;;  %v367_v45 = vld [vmem:[%s616_s4 + $0x8] sm:$0xff] }
  0x10   : > { %279 = vperm.xlu2 %493, %v247_v3   ;;  %328 = vmatpush.msra.mxu0 %v307_v10  ;;  %v366_v46 = vld [vmem:[%s616_s4] sm:$0xff] }
  0x11   : > { %358 = vmatpush.msra.mxu1 %v335_v13  ;;  %389 = vmatpush.msra.mxu2 %v369_v42  ;;  %v498_v47 = vld [vmem:[%s615_s3] ss:$0 sm:$0xff] }
  0x12   : > { %v499_v51 = vld [vmem:[%s617_s5] ss:$0 sm:$0xff] }
  0x13   : > { %359 = vmatpush.msra.mxu1 %v334_v14  ;;  %390 = vmatpush.msra.mxu2 %v368_v44 }
  0x15   : > { %360 = vmatpush.msra.mxu1 %v333_v41  ;;  %391 = vmatpush.msra.mxu2 %v367_v45 }
  0x17   : > { %490 = vset.pattern.permute.xlu0 %v511_v4  ;;  %492 = vset.pattern.permute.xlu1 %v512_v5 }
  0x18   : > { %258 = vperm.xlu0 %490, %v247_v3   ;;  %272 = vperm.xlu1 %492, %v247_v3  }
  0x19   : > { %494 = vset.pattern.permute.xlu2 %v513_v6  ;;  %392 = vmatpush.msra.mxu2 %v366_v46 }
  0x1a   : > { %286 = vperm.xlu2 %494, %v247_v3  }
  0x20   : > { %495 = vset.pattern.permute.xlu1 %v514_v7  ;;  %497 = vset.pattern.permute.xlu0 %v515_v8 }
  0x21   : > { %293 = vperm.xlu1 %495, %v247_v3  }
  0x22   : > { %496 = vset.pattern.permute.xlu2 %v515_v8 }
  0x23   : > { %300 = vperm.xlu2 %496, %v247_v3  }
  0x6a   : > { %v280_v11 = vpop.permute.xlu2 %279 }
  0x6b   : > { %vm281_vm4 = vcmp.eq.s32.totalorder %v249_v18, %v280_v11 }
  0x6c   : > { %v463_v31 = vsel %vm281_vm4, 1.0, %v516_v22 }
  0x74   : > { %v287_v19 = vpop.permute.xlu2 %286 }
  0x75   : > { %vm288_vm5 = vcmp.eq.s32.totalorder %v249_v18, %v287_v19 }
  0x76   : > { %v464_v34 = vsel %vm288_vm5, 1.0, %v516_v22 }
  0x7d   : > { %v301_v29 = vpop.permute.xlu2 %300 }
  0x7e   : > { %vm302_vm6 = vcmp.eq.s32.totalorder %v249_v18, %v301_v29 }
  0x7f   : > { %v466_v37 = vsel %vm302_vm6, 1.0, %v516_v22 }
  0x81   : > { %v252_v16 = vpop.permute.xlu0 %251  ;;  %v266_v17 = vpop.permute.xlu1 %265 }
  0x82   : > { %vm253_vm0 = vcmp.eq.s32.totalorder %v249_v18, %v252_v16  ;;  %vm267_vm1 = vcmp.eq.s32.totalorder %v249_v18, %v266_v17 }
  0x83   : > { %v459_v23 = vsel %vm253_vm0, 1.0, %v516_v22  ;;  %v461_v26 = vsel %vm267_vm1, 1.0, %v516_v22 }
  0x8a   : > { %v259_v20 = vpop.permute.xlu0 %258  ;;  %v273_v21 = vpop.permute.xlu1 %272 }
  0x8b   : > { %vm260_vm2 = vcmp.eq.s32.totalorder %v249_v18, %v259_v20  ;;  %vm274_vm3 = vcmp.eq.s32.totalorder %v249_v18, %v273_v21 }
  0x8c   : > { %v460_v24 = vsel %vm260_vm2, 1.0, %v516_v22  ;;  %v462_v28 = vsel %vm274_vm3, 1.0, %v516_v22 }
  0x8d   : > { %v263_v25 = vadd.f32 %v460_v24, %v459_v23 }
  0x8f   : > { %v270_v27 = vadd.f32 %v461_v26, %v263_v25 }
  0x91   : > { %v277_v30 = vadd.f32 %v462_v28, %v270_v27 }
  0x93   : > { %v284_v32 = vadd.f32 %v463_v31, %v277_v30  ;;  %v294_v33 = vpop.permute.xlu1 %293 }
  0x94   : > { %vm295_vm7 = vcmp.eq.s32.totalorder %v249_v18, %v294_v33 }
  0x95   : > { %v291_v35 = vadd.f32 %v464_v34, %v284_v32  ;;  %v465_v36 = vsel %vm295_vm7, 1.0, %v516_v22 }
  0x97   : > { %v298_v38 = vadd.f32 %v465_v36, %v291_v35 }
  0x99   : > { %v305_v39 = vadd.f32 %v466_v37, %v298_v38 }
  0x9b   : > { %v306_v40 = vmul.f32 0.125, %v305_v39 }
  0x9d   : > { %467 = vmatmul.msk.f32.vlgmr.msra.gmra.mxu0 %vm309_vm8, %v306_v40 }
 0x11a   : > { %v330_v43 = vpop.f32.mrf.mxu0 }
 0x11b   : > { %468 = vmatmul.msk.f32.vlgmr.msra.gmra.mxu1 %vm341_vm9, %v330_v43 }
 0x198   : > { %v362_v48 = vpop.f32.mrf.mxu1 }
 0x199   : > { %v363_v49 = vadd.f32 %v498_v47, %v362_v48 }
 0x19b   : > { %v365_v50 = vmax.f32 %v363_v49, 0.0 }
 0x19d   : > { %469 = vmatmul.msk.f32.vlgmr.msra.gmra.mxu2 %vm341_vm9, %v365_v50 }
 0x220   : > { %v394_v52 = vpop.f32.mrf.mxu2 }
 0x221   : > { %v395_v53 = vadd.f32 %v499_v51, %v394_v52 }
 0x223   : > { %398 = vst.msk [vmem:[%s246_s8] sm:$0xff] %vm397_vm10, %v395_v53 }
 0x224 PF: > { %s16_s21 = sadd.s32 1, %s506_s21  }
 0x225   : > { %p13_p4 = scmp.ge.s32.totalorder %s16_s21, 4  }
 0x227   :  { %15 = sbr.rel (!%p13_p4) target bundleno = 1 (0x1), region = 74 }

</bundles_post_ra>
